<compile_context>
chip_gen: v5e
topology: v5e:2x2
jax: 0.10.0
libtpu: 0.0.40
codegen_flags: <defaults>
</compile_context>

<pallas_src>
import functools

import jax
import jax.numpy as jnp
import numpy as np
from jax import lax
from jax.experimental import pallas as pl
from jax.experimental.pallas import tpu as pltpu


# (dy, dx) spatial offsets shared by the conv3x3 taps and the deconv phases;
# tap index t == (dy + 1) * 3 + (dx + 1).
SHIFTS = tuple((dy, dx) for dy in (-1, 0, 1) for dx in (-1, 0, 1))

# ConvTranspose2d(k=4, s=2, p=1): output row 2m+a reads input row m+dy with kernel
# row p, per DECONV_TAPS[a] = ((dy, p), ...); identical decomposition for columns.
DECONV_TAPS = {0: ((-1, 3), (0, 1)), 1: ((0, 2), (1, 0))}


def _shifted(x, mask, dy, dx, W):
    """x (C, L) shifted by (dy, dx) in image space; zero where the source is OOB.

    The shift is a flat lane rotation by dy*W+dx (single XLU rotate); `mask`
    zeroes the lanes whose source would fall outside the image (border, row wrap,
    or batch boundary of the folded layout)."""
    if dy == 0 and dx == 0:
        return x
    L = x.shape[-1]
    return pltpu.roll(x, (-(dy * W + dx)) % L, 1) * mask


def upblok_kernel(x_ref, masks_ref, w1_ref, w3_ref, wd_ref, out_ref, stk_ref,
                  *, W, Cin, Cout):
    L = x_ref.shape[-1]
    K = stk_ref.shape[0]

    # ---- conv1x1 + ReLU (bias rides on the ones row of x): (Cin,Cin+1)@(Cin+1,L)
    y1 = jnp.maximum(
        jnp.dot(w1_ref[...], x_ref[...], preferred_element_type=jnp.float32), 0.0)

    # Scratch tail: row 9*Cin is the bias (ones) row; remaining padding rows are
    # zeroed so the stacked matmul operand is fully defined.  Written once.
    stk_ref[pl.ds(9 * Cin, K - 9 * Cin), :] = (
        lax.broadcasted_iota(jnp.int32, (K - 9 * Cin, L), 0) == 0
    ).astype(jnp.float32)

    # ---- conv3x3 (pad=1) + ReLU: stack 9 masked/shifted y1 maps -> ONE matmul ----
    for t, (dy, dx) in enumerate(SHIFTS):
        stk_ref[pl.ds(t * Cin, Cin), :] = _shifted(
            y1, masks_ref[pl.ds(t, 1), :], dy, dx, W)
    y3 = jnp.maximum(
        jnp.dot(w3_ref[...], stk_ref[...], preferred_element_type=jnp.float32), 0.0)

    # ---- ConvTranspose2d(k=4, s=2, p=1): all 4 sub-pixel phases in ONE matmul ----
    # The scratch is reused with the shifted y3 maps; the ones row stays in place
    # (Cin == Cout here; it is rewritten otherwise).
    for t, (dy, dx) in enumerate(SHIFTS):
        stk_ref[pl.ds(t * Cout, Cout), :] = _shifted(
            y3, masks_ref[pl.ds(t, 1), :], dy, dx, W)
    if Cout != Cin:
        stk_ref[pl.ds(9 * Cout, K - 9 * Cout), :] = (
            lax.broadcasted_iota(jnp.int32, (K - 9 * Cout, L), 0) == 0
        ).astype(jnp.float32)

    # (4*Cout, L) phase-major slab: full (8,128) tiles -> dense, unmasked store.
    out_ref[...] = jnp.dot(wd_ref[...], stk_ref[...],
                           preferred_element_type=jnp.float32).astype(out_ref.dtype)


def upblok_pallas(x_in, masks, w1a, w3s, wds, *, W, Cin, Cout):
    L = x_in.shape[-1]
    K = w3s.shape[-1]
    kernel = functools.partial(upblok_kernel, W=W, Cin=Cin, Cout=Cout)
    return pl.pallas_call(
        kernel,
        out_shape=jax.ShapeDtypeStruct((4 * Cout, L), jnp.float32),
        grid=(1,),
        in_specs=[
            pl.BlockSpec((Cin + 1, L), lambda i: (0, 0)),    # x (+ ones row)
            pl.BlockSpec((9, L), lambda i: (0, 0)),          # border masks
            pl.BlockSpec((Cin, Cin + 1), lambda i: (0, 0)),  # conv1x1 (+ bias col)
            pl.BlockSpec((Cout, K), lambda i: (0, 0)),       # stacked conv3x3 w
            pl.BlockSpec((4 * Cout, K), lambda i: (0, 0)),   # stacked deconv w
        ],
        out_specs=pl.BlockSpec((4 * Cout, L), lambda i: (0, 0)),
        scratch_shapes=[pltpu.VMEM((K, L), jnp.float32)],
        compiler_params=pltpu.CompilerParams(dimension_semantics=("arbitrary",)),
    )(x_in, masks, w1a, w3s, wds)


def _make_shift_masks(H, W):
    """(9, H*W) 0/1 masks: mask[t, y*W+x] == 1 iff (y+dy, x+dx) is inside the image."""
    yy, xx = np.meshgrid(np.arange(H), np.arange(W), indexing="ij")
    rows = []
    for dy, dx in SHIFTS:
        ok = (yy + dy >= 0) & (yy + dy < H) & (xx + dx >= 0) & (xx + dx < W)
        rows.append(ok.reshape(-1).astype(np.float32))
    return np.stack(rows)


@jax.jit
def upblok_forward(upsampled_nchw, shortcut_nchw, params):
    """Full forward matching the PyTorch module; inputs/outputs are NCHW."""
    N, Cup, H, W = upsampled_nchw.shape
    Csc = shortcut_nchw.shape[1]
    Cin = Cup + Csc
    Cout = params["b3"].shape[0]
    L = N * H * W
    K = -(-(9 * max(Cin, Cout) + 1) // 8) * 8          # stacked K, sublane multiple

    # Fold batch onto the lane axis: (N, C, H, W) -> (C, N*H*W); append a ones row.
    up = upsampled_nchw.transpose(1, 0, 2, 3).reshape(Cup, L)
    sc = shortcut_nchw.transpose(1, 0, 2, 3).reshape(Csc, L)
    x_in = jnp.concatenate([up, sc, jnp.ones((1, L), jnp.float32)], axis=0)

    # conv1x1 weight with the bias as an extra column (multiplies the ones row).
    w1a = jnp.concatenate([params["w1"][:, :, 0, 0], params["b1"][:, None]], axis=1)

    # conv3x3 weights stacked over the 9 taps: column t*Cin + c; bias at column 9*Cin.
    w3s = params["w3"].transpose(0, 2, 3, 1).reshape(Cout, 9 * Cin)
    w3s = jnp.concatenate(
        [w3s, params["b3"][:, None],
         jnp.zeros((Cout, K - 9 * Cin - 1), jnp.float32)], axis=1)

    # Deconv weights stacked over (phase, tap): row (2a+b)*Cout + o, col t*Cout + c
    # (taps a phase does not use stay zero); bias at column 9*Cout.
    wd = params["wd"]                                   # torch layout (in, out, kH, kW)
    wds = jnp.zeros((4 * Cout, K), jnp.float32)
    for a in (0, 1):
        for b in (0, 1):
            r0 = (2 * a + b) * Cout
            for dy, p in DECONV_TAPS[a]:
                for dx, q in DECONV_TAPS[b]:
                    t = (dy + 1) * 3 + (dx + 1)
                    wds = wds.at[r0:r0 + Cout, t * Cout:(t + 1) * Cout].set(
                        wd[:, :, p, q].T)
    wds = wds.at[:, 9 * Cout].set(jnp.tile(params["bd"], 4))

    # Border masks for the 9 shifts, tiled over the folded batch.
    masks = jnp.asarray(np.tile(_make_shift_masks(H, W), (1, N)))       # (9, L)

    phases = upblok_pallas(x_in, masks, w1a, w3s, wds, W=W, Cin=Cin, Cout=Cout)

    # (2, 2, Cout, N, H, W) -> interleave sub-pixel phases -> NCHW (N, Cout, 2H, 2W)
    out = phases.reshape(2, 2, Cout, N, H, W)
    return out.transpose(3, 2, 4, 0, 5, 1).reshape(N, Cout, 2 * H, 2 * W)


def ref_forward(upsampled, shortcut, p):
    """Pure-JAX (lax.conv) reference with PyTorch semantics, NCHW."""
    dn = ("NCHW", "OIHW", "NCHW")
    x = jnp.concatenate([upsampled, shortcut], axis=1)
    x = lax.conv_general_dilated(x, p["w1"], (1, 1), [(0, 0), (0, 0)],
                                 dimension_numbers=dn) + p["b1"][None, :, None, None]
    x = jnp.maximum(x, 0.0)
    x = lax.conv_general_dilated(x, p["w3"], (1, 1), [(1, 1), (1, 1)],
                                 dimension_numbers=dn) + p["b3"][None, :, None, None]
    x = jnp.maximum(x, 0.0)
    wd_t = jnp.flip(p["wd"], axis=(2, 3)).transpose(1, 0, 2, 3)
    x = lax.conv_general_dilated(x, wd_t, (1, 1), [(2, 2), (2, 2)],
                                 lhs_dilation=(2, 2),
                                 dimension_numbers=dn) + p["bd"][None, :, None, None]
    return x


if __name__ == "__main__":
    N, H, W = 2, 16, 16
    Cup, Csc = 2, 2
    in_channels = Cup + Csc          # 4
    out_channels = 4

    key = jax.random.PRNGKey(0)
    ks = jax.random.split(key, 8)
    upsampled = jax.random.normal(ks[0], (N, Cup, H, W), jnp.float32)
    shortcut = jax.random.normal(ks[1], (N, Csc, H, W), jnp.float32)

    params = {
        "w1": jax.random.normal(ks[2], (in_channels, in_channels, 1, 1), jnp.float32) * 0.2,
        "b1": jax.random.normal(ks[3], (in_channels,), jnp.float32) * 0.1,
        "w3": jax.random.normal(ks[4], (out_channels, in_channels, 3, 3), jnp.float32) * 0.2,
        "b3": jax.random.normal(ks[5], (out_channels,), jnp.float32) * 0.1,
        "wd": jax.random.normal(ks[6], (out_channels, out_channels, 4, 4), jnp.float32) * 0.2,
        "bd": jax.random.normal(ks[7], (out_channels,), jnp.float32) * 0.1,
    }

    out = jax.block_until_ready(upblok_forward(upsampled, shortcut, params))
    expected = jax.block_until_ready(ref_forward(upsampled, shortcut, params))

    assert out.shape == (N, out_channels, 2 * H, 2 * W), out.shape
    np.testing.assert_allclose(np.asarray(out), np.asarray(expected),
                               rtol=1e-4, atol=1e-4)
    print("KERNEL_OK")
</pallas_src>

<mosaic_0001>
module attributes {stable_mosaic.version = 11 : i64} {
  func.func @upblok_kernel(%arg0: i32, %arg1: memref<5x512xf32, #tpu.memory_space<vmem>>, %arg2: memref<9x512xf32, #tpu.memory_space<vmem>>, %arg3: memref<4x5xf32, #tpu.memory_space<vmem>>, %arg4: memref<4x40xf32, #tpu.memory_space<vmem>>, %arg5: memref<16x40xf32, #tpu.memory_space<vmem>>, %arg6: memref<16x512xf32, #tpu.memory_space<vmem>>, %arg7: memref<40x512xf32, #tpu.memory_space<vmem>>) attributes {dimension_semantics = [#tpu.dimension_semantics<arbitrary>], iteration_bounds = array<i64: 1>, scalar_prefetch = 0 : i64, scratch_operands = 1 : i64, tpu.core_type = #tpu.core_type<tc>, window_params = [{pipeline_mode = #tpu.pipeline_mode<synchronous>, transform_indices = @transform_0, window_bounds = array<i64: 5, 512>}, {pipeline_mode = #tpu.pipeline_mode<synchronous>, transform_indices = @transform_1, window_bounds = array<i64: 9, 512>}, {pipeline_mode = #tpu.pipeline_mode<synchronous>, transform_indices = @transform_2, window_bounds = array<i64: 4, 5>}, {pipeline_mode = #tpu.pipeline_mode<synchronous>, transform_indices = @transform_3, window_bounds = array<i64: 4, 40>}, {pipeline_mode = #tpu.pipeline_mode<synchronous>, transform_indices = @transform_4, window_bounds = array<i64: 16, 40>}, {pipeline_mode = #tpu.pipeline_mode<synchronous>, transform_indices = @transform_5, window_bounds = array<i64: 16, 512>}]} {
    %c0 = arith.constant 0 : index
    %c0_0 = arith.constant 0 : index
    %0 = vector.load %arg3[%c0, %c0_0] : memref<4x5xf32, #tpu.memory_space<vmem>>, vector<4x5xf32>
    %c0_1 = arith.constant 0 : index
    %c0_2 = arith.constant 0 : index
    %1 = vector.load %arg1[%c0_1, %c0_2] : memref<5x512xf32, #tpu.memory_space<vmem>>, vector<5x512xf32>
    %cst = arith.constant dense<0.000000e+00> : vector<4x512xf32>
    %2 = tpu.matmul %0, %1, %cst {dimension_numbers = #tpu.dot_dimension_numbers<[1], [0], [0], [1], [0, 0, 1, 1], [], []>} : vector<4x5xf32>, vector<5x512xf32>, vector<4x512xf32> -> vector<4x512xf32>
    %cst_3 = arith.constant 0.000000e+00 : f32
    %3 = vector.broadcast %cst_3 : f32 to vector<4x512xf32>
    %4 = arith.maximumf %2, %3 : vector<4x512xf32>
    %5 = tpu.iota {dimensions = array<i32: 0>} : vector<4x512xi32>
    %c0_i32 = arith.constant 0 : i32
    %6 = vector.broadcast %c0_i32 : i32 to vector<4x512xi32>
    %7 = arith.cmpi eq, %5, %6 : vector<4x512xi32>
    %8 = arith.extui %7 : vector<4x512xi1> to vector<4x512xi32>
    %9 = arith.sitofp %8 : vector<4x512xi32> to vector<4x512xf32>
    %c36 = arith.constant 36 : index
    %c0_4 = arith.constant 0 : index
    %10 = vector.load %arg7[%c36, %c0_4] : memref<40x512xf32, #tpu.memory_space<vmem>>, vector<4x512xf32>
    tpu.vector_store %arg7[%c36, %c0_4], %9 {strides = array<i32>} : memref<40x512xf32, #tpu.memory_space<vmem>>, vector<4x512xf32>,
    %c0_5 = arith.constant 0 : index
    %c0_6 = arith.constant 0 : index
    %11 = vector.load %arg2[%c0_5, %c0_6] : memref<9x512xf32, #tpu.memory_space<vmem>>, vector<1x512xf32>
    %c17_i32 = arith.constant 17 : i32
    %12 = tpu.dynamic_rotate %4 by %c17_i32 dim 1 : vector<4x512xf32>, i32 -> vector<4x512xf32>
    %13 = vector.broadcast %11 : vector<1x512xf32> to vector<4x512xf32>
    %14 = arith.mulf %12, %13 : vector<4x512xf32>
    %c0_7 = arith.constant 0 : index
    %c0_8 = arith.constant 0 : index
    %15 = vector.load %arg7[%c0_7, %c0_8] : memref<40x512xf32, #tpu.memory_space<vmem>>, vector<4x512xf32>
    tpu.vector_store %arg7[%c0_7, %c0_8], %14 {strides = array<i32>} : memref<40x512xf32, #tpu.memory_space<vmem>>, vector<4x512xf32>,
    %c1 = arith.constant 1 : index
    %c0_9 = arith.constant 0 : index
    %16 = vector.load %arg2[%c1, %c0_9] : memref<9x512xf32, #tpu.memory_space<vmem>>, vector<1x512xf32>
    %c16_i32 = arith.constant 16 : i32
    %17 = tpu.dynamic_rotate %4 by %c16_i32 dim 1 : vector<4x512xf32>, i32 -> vector<4x512xf32>
    %18 = vector.broadcast %16 : vector<1x512xf32> to vector<4x512xf32>
    %19 = arith.mulf %17, %18 : vector<4x512xf32>
    %c4 = arith.constant 4 : index
    %c0_10 = arith.constant 0 : index
    %20 = vector.load %arg7[%c4, %c0_10] : memref<40x512xf32, #tpu.memory_space<vmem>>, vector<4x512xf32>
    tpu.vector_store %arg7[%c4, %c0_10], %19 {strides = array<i32>} : memref<40x512xf32, #tpu.memory_space<vmem>>, vector<4x512xf32>,
    %c2 = arith.constant 2 : index
    %c0_11 = arith.constant 0 : index
    %21 = vector.load %arg2[%c2, %c0_11] : memref<9x512xf32, #tpu.memory_space<vmem>>, vector<1x512xf32>
    %c15_i32 = arith.constant 15 : i32
    %22 = tpu.dynamic_rotate %4 by %c15_i32 dim 1 : vector<4x512xf32>, i32 -> vector<4x512xf32>
    %23 = vector.broadcast %21 : vector<1x512xf32> to vector<4x512xf32>
    %24 = arith.mulf %22, %23 : vector<4x512xf32>
    %c8 = arith.constant 8 : index
    %c0_12 = arith.constant 0 : index
    %25 = vector.load %arg7[%c8, %c0_12] : memref<40x512xf32, #tpu.memory_space<vmem>>, vector<4x512xf32>
    tpu.vector_store %arg7[%c8, %c0_12], %24 {strides = array<i32>} : memref<40x512xf32, #tpu.memory_space<vmem>>, vector<4x512xf32>,
    %c3 = arith.constant 3 : index
    %c0_13 = arith.constant 0 : index
    %26 = vector.load %arg2[%c3, %c0_13] : memref<9x512xf32, #tpu.memory_space<vmem>>, vector<1x512xf32>
    %c1_i32 = arith.constant 1 : i32
    %27 = tpu.dynamic_rotate %4 by %c1_i32 dim 1 : vector<4x512xf32>, i32 -> vector<4x512xf32>
    %28 = vector.broadcast %26 : vector<1x512xf32> to vector<4x512xf32>
    %29 = arith.mulf %27, %28 : vector<4x512xf32>
    %c12 = arith.constant 12 : index
    %c0_14 = arith.constant 0 : index
    %30 = vector.load %arg7[%c12, %c0_14] : memref<40x512xf32, #tpu.memory_space<vmem>>, vector<4x512xf32>
    tpu.vector_store %arg7[%c12, %c0_14], %29 {strides = array<i32>} : memref<40x512xf32, #tpu.memory_space<vmem>>, vector<4x512xf32>,
    %c16 = arith.constant 16 : index
    %c0_15 = arith.constant 0 : index
    %31 = vector.load %arg7[%c16, %c0_15] : memref<40x512xf32, #tpu.memory_space<vmem>>, vector<4x512xf32>
    tpu.vector_store %arg7[%c16, %c0_15], %4 {strides = array<i32>} : memref<40x512xf32, #tpu.memory_space<vmem>>, vector<4x512xf32>,
    %c5 = arith.constant 5 : index
    %c0_16 = arith.constant 0 : index
    %32 = vector.load %arg2[%c5, %c0_16] : memref<9x512xf32, #tpu.memory_space<vmem>>, vector<1x512xf32>
    %c511_i32 = arith.constant 511 : i32
    %33 = tpu.dynamic_rotate %4 by %c511_i32 dim 1 : vector<4x512xf32>, i32 -> vector<4x512xf32>
    %34 = vector.broadcast %32 : vector<1x512xf32> to vector<4x512xf32>
    %35 = arith.mulf %33, %34 : vector<4x512xf32>
    %c20 = arith.constant 20 : index
    %c0_17 = arith.constant 0 : index
    %36 = vector.load %arg7[%c20, %c0_17] : memref<40x512xf32, #tpu.memory_space<vmem>>, vector<4x512xf32>
    tpu.vector_store %arg7[%c20, %c0_17], %35 {strides = array<i32>} : memref<40x512xf32, #tpu.memory_space<vmem>>, vector<4x512xf32>,
    %c6 = arith.constant 6 : index
    %c0_18 = arith.constant 0 : index
    %37 = vector.load %arg2[%c6, %c0_18] : memref<9x512xf32, #tpu.memory_space<vmem>>, vector<1x512xf32>
    %c497_i32 = arith.constant 497 : i32
    %38 = tpu.dynamic_rotate %4 by %c497_i32 dim 1 : vector<4x512xf32>, i32 -> vector<4x512xf32>
    %39 = vector.broadcast %37 : vector<1x512xf32> to vector<4x512xf32>
    %40 = arith.mulf %38, %39 : vector<4x512xf32>
    %c24 = arith.constant 24 : index
    %c0_19 = arith.constant 0 : index
    %41 = vector.load %arg7[%c24, %c0_19] : memref<40x512xf32, #tpu.memory_space<vmem>>, vector<4x512xf32>
    tpu.vector_store %arg7[%c24, %c0_19], %40 {strides = array<i32>} : memref<40x512xf32, #tpu.memory_space<vmem>>, vector<4x512xf32>,
    %c7 = arith.constant 7 : index
    %c0_20 = arith.constant 0 : index
    %42 = vector.load %arg2[%c7, %c0_20] : memref<9x512xf32, #tpu.memory_space<vmem>>, vector<1x512xf32>
    %c496_i32 = arith.constant 496 : i32
    %43 = tpu.dynamic_rotate %4 by %c496_i32 dim 1 : vector<4x512xf32>, i32 -> vector<4x512xf32>
    %44 = vector.broadcast %42 : vector<1x512xf32> to vector<4x512xf32>
    %45 = arith.mulf %43, %44 : vector<4x512xf32>
    %c28 = arith.constant 28 : index
    %c0_21 = arith.constant 0 : index
    %46 = vector.load %arg7[%c28, %c0_21] : memref<40x512xf32, #tpu.memory_space<vmem>>, vector<4x512xf32>
    tpu.vector_store %arg7[%c28, %c0_21], %45 {strides = array<i32>} : memref<40x512xf32, #tpu.memory_space<vmem>>, vector<4x512xf32>,
    %c8_22 = arith.constant 8 : index
    %c0_23 = arith.constant 0 : index
    %47 = vector.load %arg2[%c8_22, %c0_23] : memref<9x512xf32, #tpu.memory_space<vmem>>, vector<1x512xf32>
    %c495_i32 = arith.constant 495 : i32
    %48 = tpu.dynamic_rotate %4 by %c495_i32 dim 1 : vector<4x512xf32>, i32 -> vector<4x512xf32>
    %49 = vector.broadcast %47 : vector<1x512xf32> to vector<4x512xf32>
    %50 = arith.mulf %48, %49 : vector<4x512xf32>
    %c32 = arith.constant 32 : index
    %c0_24 = arith.constant 0 : index
    %51 = vector.load %arg7[%c32, %c0_24] : memref<40x512xf32, #tpu.memory_space<vmem>>, vector<4x512xf32>
    tpu.vector_store %arg7[%c32, %c0_24], %50 {strides = array<i32>} : memref<40x512xf32, #tpu.memory_space<vmem>>, vector<4x512xf32>,
    %c0_25 = arith.constant 0 : index
    %c0_26 = arith.constant 0 : index
    %52 = vector.load %arg4[%c0_25, %c0_26] : memref<4x40xf32, #tpu.memory_space<vmem>>, vector<4x40xf32>
    %c0_27 = arith.constant 0 : index
    %c0_28 = arith.constant 0 : index
    %53 = vector.load %arg7[%c0_27, %c0_28] : memref<40x512xf32, #tpu.memory_space<vmem>>, vector<40x512xf32>
    %cst_29 = arith.constant dense<0.000000e+00> : vector<4x512xf32>
    %54 = tpu.matmul %52, %53, %cst_29 {dimension_numbers = #tpu.dot_dimension_numbers<[1], [0], [0], [1], [0, 0, 1, 1], [], []>} : vector<4x40xf32>, vector<40x512xf32>, vector<4x512xf32> -> vector<4x512xf32>
    %cst_30 = arith.constant 0.000000e+00 : f32
    %55 = vector.broadcast %cst_30 : f32 to vector<4x512xf32>
    %56 = arith.maximumf %54, %55 : vector<4x512xf32>
    %c0_31 = arith.constant 0 : index
    %c0_32 = arith.constant 0 : index
    %57 = vector.load %arg2[%c0_31, %c0_32] : memref<9x512xf32, #tpu.memory_space<vmem>>, vector<1x512xf32>
    %c17_i32_33 = arith.constant 17 : i32
    %58 = tpu.dynamic_rotate %56 by %c17_i32_33 dim 1 : vector<4x512xf32>, i32 -> vector<4x512xf32>
    %59 = vector.broadcast %57 : vector<1x512xf32> to vector<4x512xf32>
    %60 = arith.mulf %58, %59 : vector<4x512xf32>
    %c0_34 = arith.constant 0 : index
    %c0_35 = arith.constant 0 : index
    %61 = vector.load %arg7[%c0_34, %c0_35] : memref<40x512xf32, #tpu.memory_space<vmem>>, vector<4x512xf32>
    tpu.vector_store %arg7[%c0_34, %c0_35], %60 {strides = array<i32>} : memref<40x512xf32, #tpu.memory_space<vmem>>, vector<4x512xf32>,
    %c1_36 = arith.constant 1 : index
    %c0_37 = arith.constant 0 : index
    %62 = vector.load %arg2[%c1_36, %c0_37] : memref<9x512xf32, #tpu.memory_space<vmem>>, vector<1x512xf32>
    %c16_i32_38 = arith.constant 16 : i32
    %63 = tpu.dynamic_rotate %56 by %c16_i32_38 dim 1 : vector<4x512xf32>, i32 -> vector<4x512xf32>
    %64 = vector.broadcast %62 : vector<1x512xf32> to vector<4x512xf32>
    %65 = arith.mulf %63, %64 : vector<4x512xf32>
    %c4_39 = arith.constant 4 : index
    %c0_40 = arith.constant 0 : index
    %66 = vector.load %arg7[%c4_39, %c0_40] : memref<40x512xf32, #tpu.memory_space<vmem>>, vector<4x512xf32>
    tpu.vector_store %arg7[%c4_39, %c0_40], %65 {strides = array<i32>} : memref<40x512xf32, #tpu.memory_space<vmem>>, vector<4x512xf32>,
    %c2_41 = arith.constant 2 : index
    %c0_42 = arith.constant 0 : index
    %67 = vector.load %arg2[%c2_41, %c0_42] : memref<9x512xf32, #tpu.memory_space<vmem>>, vector<1x512xf32>
    %c15_i32_43 = arith.constant 15 : i32
    %68 = tpu.dynamic_rotate %56 by %c15_i32_43 dim 1 : vector<4x512xf32>, i32 -> vector<4x512xf32>
    %69 = vector.broadcast %67 : vector<1x512xf32> to vector<4x512xf32>
    %70 = arith.mulf %68, %69 : vector<4x512xf32>
    %c8_44 = arith.constant 8 : index
    %c0_45 = arith.constant 0 : index
    %71 = vector.load %arg7[%c8_44, %c0_45] : memref<40x512xf32, #tpu.memory_space<vmem>>, vector<4x512xf32>
    tpu.vector_store %arg7[%c8_44, %c0_45], %70 {strides = array<i32>} : memref<40x512xf32, #tpu.memory_space<vmem>>, vector<4x512xf32>,
    %c3_46 = arith.constant 3 : index
    %c0_47 = arith.constant 0 : index
    %72 = vector.load %arg2[%c3_46, %c0_47] : memref<9x512xf32, #tpu.memory_space<vmem>>, vector<1x512xf32>
    %c1_i32_48 = arith.constant 1 : i32
    %73 = tpu.dynamic_rotate %56 by %c1_i32_48 dim 1 : vector<4x512xf32>, i32 -> vector<4x512xf32>
    %74 = vector.broadcast %72 : vector<1x512xf32> to vector<4x512xf32>
    %75 = arith.mulf %73, %74 : vector<4x512xf32>
    %c12_49 = arith.constant 12 : index
    %c0_50 = arith.constant 0 : index
    %76 = vector.load %arg7[%c12_49, %c0_50] : memref<40x512xf32, #tpu.memory_space<vmem>>, vector<4x512xf32>
    tpu.vector_store %arg7[%c12_49, %c0_50], %75 {strides = array<i32>} : memref<40x512xf32, #tpu.memory_space<vmem>>, vector<4x512xf32>,
    %c16_51 = arith.constant 16 : index
    %c0_52 = arith.constant 0 : index
    %77 = vector.load %arg7[%c16_51, %c0_52] : memref<40x512xf32, #tpu.memory_space<vmem>>, vector<4x512xf32>
    tpu.vector_store %arg7[%c16_51, %c0_52], %56 {strides = array<i32>} : memref<40x512xf32, #tpu.memory_space<vmem>>, vector<4x512xf32>,
    %c5_53 = arith.constant 5 : index
    %c0_54 = arith.constant 0 : index
    %78 = vector.load %arg2[%c5_53, %c0_54] : memref<9x512xf32, #tpu.memory_space<vmem>>, vector<1x512xf32>
    %c511_i32_55 = arith.constant 511 : i32
    %79 = tpu.dynamic_rotate %56 by %c511_i32_55 dim 1 : vector<4x512xf32>, i32 -> vector<4x512xf32>
    %80 = vector.broadcast %78 : vector<1x512xf32> to vector<4x512xf32>
    %81 = arith.mulf %79, %80 : vector<4x512xf32>
    %c20_56 = arith.constant 20 : index
    %c0_57 = arith.constant 0 : index
    %82 = vector.load %arg7[%c20_56, %c0_57] : memref<40x512xf32, #tpu.memory_space<vmem>>, vector<4x512xf32>
    tpu.vector_store %arg7[%c20_56, %c0_57], %81 {strides = array<i32>} : memref<40x512xf32, #tpu.memory_space<vmem>>, vector<4x512xf32>,
    %c6_58 = arith.constant 6 : index
    %c0_59 = arith.constant 0 : index
    %83 = vector.load %arg2[%c6_58, %c0_59] : memref<9x512xf32, #tpu.memory_space<vmem>>, vector<1x512xf32>
    %c497_i32_60 = arith.constant 497 : i32
    %84 = tpu.dynamic_rotate %56 by %c497_i32_60 dim 1 : vector<4x512xf32>, i32 -> vector<4x512xf32>
    %85 = vector.broadcast %83 : vector<1x512xf32> to vector<4x512xf32>
    %86 = arith.mulf %84, %85 : vector<4x512xf32>
    %c24_61 = arith.constant 24 : index
    %c0_62 = arith.constant 0 : index
    %87 = vector.load %arg7[%c24_61, %c0_62] : memref<40x512xf32, #tpu.memory_space<vmem>>, vector<4x512xf32>
    tpu.vector_store %arg7[%c24_61, %c0_62], %86 {strides = array<i32>} : memref<40x512xf32, #tpu.memory_space<vmem>>, vector<4x512xf32>,
    %c7_63 = arith.constant 7 : index
    %c0_64 = arith.constant 0 : index
    %88 = vector.load %arg2[%c7_63, %c0_64] : memref<9x512xf32, #tpu.memory_space<vmem>>, vector<1x512xf32>
    %c496_i32_65 = arith.constant 496 : i32
    %89 = tpu.dynamic_rotate %56 by %c496_i32_65 dim 1 : vector<4x512xf32>, i32 -> vector<4x512xf32>
    %90 = vector.broadcast %88 : vector<1x512xf32> to vector<4x512xf32>
    %91 = arith.mulf %89, %90 : vector<4x512xf32>
    %c28_66 = arith.constant 28 : index
    %c0_67 = arith.constant 0 : index
    %92 = vector.load %arg7[%c28_66, %c0_67] : memref<40x512xf32, #tpu.memory_space<vmem>>, vector<4x512xf32>
    tpu.vector_store %arg7[%c28_66, %c0_67], %91 {strides = array<i32>} : memref<40x512xf32, #tpu.memory_space<vmem>>, vector<4x512xf32>,
    %c8_68 = arith.constant 8 : index
    %c0_69 = arith.constant 0 : index
    %93 = vector.load %arg2[%c8_68, %c0_69] : memref<9x512xf32, #tpu.memory_space<vmem>>, vector<1x512xf32>
    %c495_i32_70 = arith.constant 495 : i32
    %94 = tpu.dynamic_rotate %56 by %c495_i32_70 dim 1 : vector<4x512xf32>, i32 -> vector<4x512xf32>
    %95 = vector.broadcast %93 : vector<1x512xf32> to vector<4x512xf32>
    %96 = arith.mulf %94, %95 : vector<4x512xf32>
    %c32_71 = arith.constant 32 : index
    %c0_72 = arith.constant 0 : index
    %97 = vector.load %arg7[%c32_71, %c0_72] : memref<40x512xf32, #tpu.memory_space<vmem>>, vector<4x512xf32>
    tpu.vector_store %arg7[%c32_71, %c0_72], %96 {strides = array<i32>} : memref<40x512xf32, #tpu.memory_space<vmem>>, vector<4x512xf32>,
    %c0_73 = arith.constant 0 : index
    %c0_74 = arith.constant 0 : index
    %98 = vector.load %arg5[%c0_73, %c0_74] : memref<16x40xf32, #tpu.memory_space<vmem>>, vector<16x40xf32>
    %c0_75 = arith.constant 0 : index
    %c0_76 = arith.constant 0 : index
    %99 = vector.load %arg7[%c0_75, %c0_76] : memref<40x512xf32, #tpu.memory_space<vmem>>, vector<40x512xf32>
    %cst_77 = arith.constant dense<0.000000e+00> : vector<16x512xf32>
    %100 = tpu.matmul %98, %99, %cst_77 {dimension_numbers = #tpu.dot_dimension_numbers<[1], [0], [0], [1], [0, 0, 1, 1], [], []>} : vector<16x40xf32>, vector<40x512xf32>, vector<16x512xf32> -> vector<16x512xf32>
    %c0_78 = arith.constant 0 : index
    %c0_79 = arith.constant 0 : index
    %101 = vector.load %arg6[%c0_78, %c0_79] : memref<16x512xf32, #tpu.memory_space<vmem>>, vector<16x512xf32>
    tpu.vector_store %arg6[%c0_78, %c0_79], %100 {strides = array<i32>} : memref<16x512xf32, #tpu.memory_space<vmem>>, vector<16x512xf32>,
    return
  }
  func.func @transform_0(%arg0: i32) -> (i32, i32) {
    %c0_i32 = arith.constant 0 : i32
    %c0_i32_0 = arith.constant 0 : i32
    %c0_i32_1 = arith.constant 0 : i32
    return %c0_i32, %c0_i32_0 : i32, i32
  }
  func.func @transform_1(%arg0: i32) -> (i32, i32) {
    %c0_i32 = arith.constant 0 : i32
    %c0_i32_0 = arith.constant 0 : i32
    %c0_i32_1 = arith.constant 0 : i32
    return %c0_i32, %c0_i32_0 : i32, i32
  }
  func.func @transform_2(%arg0: i32) -> (i32, i32) {
    %c0_i32 = arith.constant 0 : i32
    %c0_i32_0 = arith.constant 0 : i32
    %c0_i32_1 = arith.constant 0 : i32
    return %c0_i32, %c0_i32_0 : i32, i32
  }
  func.func @transform_3(%arg0: i32) -> (i32, i32) {
    %c0_i32 = arith.constant 0 : i32
    %c0_i32_0 = arith.constant 0 : i32
    %c0_i32_1 = arith.constant 0 : i32
    return %c0_i32, %c0_i32_0 : i32, i32
  }
  func.func @transform_4(%arg0: i32) -> (i32, i32) {
    %c0_i32 = arith.constant 0 : i32
    %c0_i32_0 = arith.constant 0 : i32
    %c0_i32_1 = arith.constant 0 : i32
    return %c0_i32, %c0_i32_0 : i32, i32
  }
  func.func @transform_5(%arg0: i32) -> (i32, i32) {
    %c0_i32 = arith.constant 0 : i32
    %c0_i32_0 = arith.constant 0 : i32
    %c0_i32_1 = arith.constant 0 : i32
    return %c0_i32, %c0_i32_0 : i32, i32
  }
}

</mosaic_0001>

<bundles_post_ra>
// kernel: tile.8
= control target key start
LH: loop header
LB: loop body
LE: loop exit
PB: predicated region body
PF: predicated region fallthrough
CT: control target
= control target key end

     0   :  { %s22_s0 = inlined_call_operand.vmem [shape: f32[4], index: 0, kind: input, shape index: {}]   ;;  %s23_s1 = inlined_call_operand.vmem [shape: f32[4,4], index: 1, kind: output, shape index: {}]  }
   0x1   :  { %v4_v0 = vld [vmem:[%s22_s0] ss:$0 sm:$0xff] }
   0x2   :  { %5 = vst [vmem:[%s23_s1] sm:$0xf] %v4_v0 }

// kernel: upblok_forward.1
= control target key start
LH: loop header
LB: loop body
LE: loop exit
PB: predicated region body
PF: predicated region fallthrough
CT: control target
= control target key end

     0   :  { %vm29_vm0 = vcmask 1044480   ;;  %vm25_vm1 = vcmask 39936   ;;  %s1025_s28 = smov 111   ;;  %s1026_s29 = smov 112   ;;  %v126_v13 = vlaneseq  ;;  %v1032_v15 = vmov 0.0   ;;  %s1491_s0 = inlined_call_operand.vmem [shape: f32[5,512], index: 0, kind: input, shape index: {}]   ;;  %s1492_s2 = inlined_call_operand.vmem [shape: f32[4,5], index: 2, kind: input, shape index: {}]   ;;  %s1493_s1 = inlined_call_operand.vmem [shape: f32[9,512], index: 1, kind: input, shape index: {}]   ;;  %s1494_s3 = inlined_call_operand.vmem [shape: f32[4,40], index: 3, kind: input, shape index: {}]   ;;  %s1495_s4 = inlined_call_operand.vmem [shape: f32[16,40], index: 4, kind: input, shape index: {}]   ;;  %s1496_s5 = inlined_call_operand.vmem [shape: f32[16,512], index: 5, kind: output, shape index: {}]  }
   0x1   :  { %v21_v0 = vld [vmem:[%s1491_s0] sm:$0x1f]  ;;  %v22_v1 = vld [vmem:[%s1491_s0 + $0x8] sm:$0x1f]  ;;  %v23_v3 = vld [vmem:[%s1491_s0 + $0x10] sm:$0x1f] }
   0x2   :  { %v20_v2 = vld [vmem:[%s1492_s2] sm:$0xf]  ;;  %980 = vmatpush.msk.msra.mxu0 %vm29_vm0, %v21_v0  ;;  %982 = vmatpush.msk.msra.mxu1 %vm29_vm0, %v22_v1  ;;  %v24_v4 = vld [vmem:[%s1491_s0 + $0x18] sm:$0x1f]  ;;  %s1024_s2 = smov 17   ;;  %s1027_s0 = smov 127  }
   0x3   :  { %981 = vmatmul.msk.f32.vlgmr.msra.gmra.mxu0 %vm25_vm1, %v20_v2  ;;  %983 = vmatmul.msk.f32.vlgmr.msra.gmra.mxu1 %vm25_vm1, %v20_v2  ;;  %s1028_s30 = smov 1   ;;  %s1029_s6 = smov 113   ;;  %v127_v14 = vshrl.u32 %v126_v13, 7  ;;  %v1114_v21 = vand.u32 127, %v126_v13  ;;  %vm468_vm11 = vcmask 326656  }
   0x4   :  { %984 = vmatpush.msk.msra.mxu2 %vm29_vm0, %v23_v3  ;;  %986 = vmatpush.msk.msra.mxu3 %vm29_vm0, %v24_v4  ;;  %s1030_s7 = smov 16   ;;  %s1031_s8 = smov 15   ;;  %v995_v22 = vld [vmem:[%s1493_s1 + $0x20] ss:$8 sm:$0xf] }
   0x5   :  { %985 = vmatmul.msk.f32.vlgmr.msra.gmra.mxu2 %vm25_vm1, %v20_v2  ;;  %987 = vmatmul.msk.f32.vlgmr.msra.gmra.mxu3 %vm25_vm1, %v20_v2  ;;  %vm128_vm2 = vcmp.eq.s32.totalorder %v127_v14, 0  ;;  %vm425_vm3 = vcmp.lt.s32.totalorder %v1114_v21, 111  ;;  %v433_v23 = vperm.slane %v995_v22, 2  ;;  %v434_v24 = vperm.slane %v995_v22, 3 }
   0x6   :  { %v988_v16 = vsel %vm128_vm2, 1.0, %v1032_v15  ;;  %v1129_v32 = vld [vmem:[%s1493_s1 + $0x5] ss:$8 sm:$0xf]  ;;  %v431_v33 = vperm.slane %v995_v22, 0  ;;  %v432_v34 = vperm.slane %v995_v22, 1 }
   0x7   :  { %v132_v17 = vrot.slane %v988_v16, 4  ;;  %vm305_vm4 = vcmp.lt.s32.totalorder %v1114_v21, 127  ;;  %v311_v35 = vperm.slane %v1129_v32, 0  ;;  %v314_v36 = vperm.slane %v1129_v32, 3 }
   0x8   :  { %v1146_v50 = vld [vmem:[%s1493_s1 + $0x6] ss:$8 sm:$0xf]  ;;  %vm349_vm5 = vcmp.lt.s32.totalorder %v1114_v21, 113  ;;  %vm257_vm6 = vcmp.lt.s32.totalorder %v1114_v21, 1  ;;  %vm381_vm7 = vcmp.lt.s32.totalorder %v1114_v21, 112 }
   0x9   :  { %137 = vst [vmem:[#allocation2 + $0x98] sm:$0xf0] %v132_v17  ;;  %v358_v53 = vperm.slane %v1146_v50, 3  ;;  %v1158_v58 = vld [vmem:[%s1493_s1 + $0x3] ss:$8 sm:$0xf] }
   0xa   :  { %134 = vst [vmem:[#allocation2 + $0x80] sm:$0xf0] %v132_v17  ;;  %v1163_v61 = vld [vmem:[%s1493_s1 + $0x7] ss:$8 sm:$0xf]  ;;  %v263_v63 = vperm.slane %v1158_v58, 0 }
   0xb   :  { %135 = vst [vmem:[#allocation2 + $0x18] sm:$0xf0] %v132_v17  ;;  %v390_v0 = vperm.slane %v1163_v61, 3  ;;  %v264_v1 = vperm.slane %v1158_v58, 1  ;;  %v312_v14 = vperm.slane %v1129_v32, 1  ;;  %v313_v15 = vperm.slane %v1129_v32, 2 }
   0xc   :  { %136 = vst [vmem:[#allocation2 + $0x30] sm:$0xf0] %v132_v17  ;;  %vm181_vm8 = vcmp.lt.s32.totalorder %v1114_v21, 16  ;;  %vm225_vm9 = vcmp.lt.s32.totalorder %v1114_v21, 15  ;;  %vm149_vm10 = vcmp.lt.s32.totalorder %v1114_v21, 17 }
  0x80   :  { %v59_v5 = vpop.f32.mrf.mxu0  ;;  %v79_v6 = vpop.f32.mrf.mxu1 }
  0x81   :  { %v122_v7 = vmax.f32 %v59_v5, 0.0  ;;  %v123_v8 = vmax.f32 %v79_v6, 0.0 }
  0x83   :  { %291 = vst [vmem:[#allocation2 + $0x38] sm:$0xf] %v122_v7  ;;  %141 = vrot.lane.b32.xlu2 %v123_v8, %s1024_s2  ;;  %417 = vrot.lane.b32.xlu1 %v122_v7, %s1025_s28 }
  0x84   :  { %292 = vst [vmem:[#allocation2 + $0x90] sm:$0xf] %v123_v8  ;;  %373 = vrot.lane.b32.xlu0 %v122_v7, %s1026_s29 }
  0x88   :  { %v99_v9 = vpop.f32.mrf.mxu2  ;;  %v119_v10 = vpop.f32.mrf.mxu3 }
  0x89   :  { %v124_v11 = vmax.f32 %v99_v9, 0.0  ;;  %v125_v12 = vmax.f32 %v119_v10, 0.0 }
  0x8b   :  { %299 = vrot.lane.b32.xlu2 %v123_v8, %s1027_s0  ;;  %419 = vrot.lane.b32.xlu1 %v123_v8, %s1025_s28  ;;  %293 = vst [vmem:[#allocation2 + $0x78] sm:$0xf] %v124_v11 }
  0x8c   :  { %297 = vrot.lane.b32.xlu0 %v122_v7, %s1027_s0  ;;  %294 = vst [vmem:[#allocation2 + $0x40] sm:$0xf] %v125_v12 }
  0x93   :  { %421 = vrot.lane.b32.xlu2 %v124_v11, %s1025_s28  ;;  %249 = vrot.lane.b32.xlu1 %v122_v7, %s1028_s30 }
  0x94   :  { %341 = vrot.lane.b32.xlu0 %v122_v7, %s1029_s6 }
  0x9b   :  { %423 = vrot.lane.b32.xlu2 %v125_v12, %s1025_s28  ;;  %379 = vrot.lane.b32.xlu1 %v125_v12, %s1026_s29 }
  0x9c   :  { %251 = vrot.lane.b32.xlu0 %v123_v8, %s1028_s30 }
  0xa3   :  { %303 = vrot.lane.b32.xlu2 %v125_v12, %s1027_s0  ;;  %301 = vrot.lane.b32.xlu1 %v124_v11, %s1027_s0 }
  0xa4   :  { %175 = vrot.lane.b32.xlu0 %v123_v8, %s1030_s7 }
  0xab   :  { %347 = vrot.lane.b32.xlu2 %v125_v12, %s1029_s6  ;;  %345 = vrot.lane.b32.xlu1 %v124_v11, %s1029_s6 }
  0xac   :  { %219 = vrot.lane.b32.xlu0 %v123_v8, %s1031_s8 }
  0xb3   :  { %255 = vrot.lane.b32.xlu2 %v125_v12, %s1028_s30  ;;  %253 = vrot.lane.b32.xlu1 %v124_v11, %s1028_s30 }
  0xb4   :  { %375 = vrot.lane.b32.xlu0 %v123_v8, %s1026_s29 }
  0xbb   :  { %179 = vrot.lane.b32.xlu2 %v125_v12, %s1030_s7  ;;  %177 = vrot.lane.b32.xlu1 %v124_v11, %s1030_s7 }
  0xbc   :  { %343 = vrot.lane.b32.xlu0 %v123_v8, %s1029_s6 }
  0xc3   :  { %223 = vrot.lane.b32.xlu2 %v125_v12, %s1031_s8  ;;  %221 = vrot.lane.b32.xlu1 %v124_v11, %s1031_s8 }
  0xc4   :  { %377 = vrot.lane.b32.xlu0 %v124_v11, %s1026_s29 }
  0xcb   :  { %173 = vrot.lane.b32.xlu2 %v122_v7, %s1030_s7  ;;  %145 = vrot.lane.b32.xlu1 %v125_v12, %s1024_s2 }
  0xcc   :  { %143 = vrot.lane.b32.xlu0 %v124_v11, %s1024_s2 }
  0xd3   :  { %139 = vrot.lane.b32.xlu1 %v122_v7, %s1024_s2 }
  0xd4   :  { %217 = vrot.lane.b32.xlu0 %v122_v7, %s1031_s8 }
  0xdd   :  { %v1110_v18 = vpop.permute.xlu2 %141 }
  0xe5   :  { %v1112_v19 = vpop.permute.xlu2 %299 }
  0xed   :  { %v422_v20 = vpop.permute.xlu2 %421 }
  0xf5   :  { %v424_v25 = vpop.permute.xlu2 %423  ;;  %v418_v26 = vpop.permute.xlu1 %417 }
  0xf6   :  { %v426_v27 = vsel %vm425_vm3, %v422_v20, %v424_v25  ;;  %v429_v28 = vsel %vm425_vm3, %v424_v25, %v418_v26  ;;  %v1124_v29 = vpop.permute.xlu0 %373 }
  0xf7   :  { %v441_v30 = vmul.f32 %v433_v23, %v426_v27  ;;  %v442_v31 = vmul.f32 %v434_v24, %v429_v28 }
  0xf9   :  { %445 = vst [vmem:[#allocation2 + $0x30] sm:$0xf] %v441_v30  ;;  %v357_v30 = vperm.slane %v1146_v50, 2 }
  0xfa   :  { %446 = vst [vmem:[#allocation2 + $0x98] sm:$0xf] %v442_v31 }
  0xfd   :  { %v304_v37 = vpop.permute.xlu2 %303  ;;  %v420_v38 = vpop.permute.xlu1 %419 }
  0xfe   :  { %v427_v39 = vsel %vm425_vm3, %v420_v38, %v422_v20  ;;  %v428_v40 = vsel %vm425_vm3, %v418_v26, %v420_v38  ;;  %v298_v41 = vpop.permute.xlu0 %297 }
  0xff   :  { %v439_v42 = vmul.f32 %v431_v33, %v428_v40  ;;  %v440_v43 = vmul.f32 %v432_v34, %v427_v39  ;;  %v308_v44 = vsel %vm305_vm4, %v298_v41, %v1112_v19  ;;  %v309_v45 = vsel %vm305_vm4, %v304_v37, %v298_v41 }
 0x100   :  { %v319_v46 = vmul.f32 %v311_v35, %v308_v44  ;;  %v322_v47 = vmul.f32 %v314_v36, %v309_v45  ;;  %v466_v48 = vld [vmem:[#allocation2 + $0x30] sm:$0xff]  ;;  %v265_v39 = vperm.slane %v1158_v58, 2  ;;  %v266_v40 = vperm.slane %v1158_v58, 3 }
 0x101   :  { %443 = vst [vmem:[#allocation2 + $0x80] sm:$0xf] %v439_v42  ;;  %v467_v49 = vld [vmem:[#allocation2 + $0x98] sm:$0xff]  ;;  %523 = vmatpush.msrb.mxu2 %v466_v48 }
 0x102   :  { %444 = vst [vmem:[#allocation2 + $0x18] sm:$0xf] %v440_v43  ;;  %v327_v51 = vrot.slane %v319_v46, 4  ;;  %v330_v52 = vrot.slane %v322_v47, 4  ;;  %543 = vmatpush.msrb.mxu3 %v467_v49  ;;  %v387_v43 = vperm.slane %v1163_v61, 0 }
 0x103   :  { %v989_v36 = vld [vmem:[%s1493_s1 + $0x1] ss:$8 sm:$0xf] }
 0x104   :  { %335 = vst [vmem:[#allocation2 + $0x38] sm:$0xf0] %v327_v51  ;;  %v188_v38 = vperm.slane %v989_v36, 1 }
 0x105   :  { %338 = vst [vmem:[#allocation2 + $0x40] sm:$0xf0] %v330_v52  ;;  %v348_v54 = vpop.permute.xlu2 %347  ;;  %v250_v55 = vpop.permute.xlu1 %249 }
 0x106   :  { %v1150_v56 = vpop.permute.xlu0 %341 }
 0x107   :  { %v353_v57 = vsel %vm349_vm5, %v348_v54, %v1150_v56 }
 0x108   :  { %v366_v59 = vmul.f32 %v358_v53, %v353_v57  ;;  %v464_v60 = vld [vmem:[#allocation2 + $0x80] sm:$0xff] }
 0x109   :  { %483 = vmatpush.msrb.mxu0 %v464_v60  ;;  %v465_v62 = vld [vmem:[#allocation2 + $0x18] sm:$0xff] }
 0x10a   :  { %370 = vst [vmem:[#allocation2 + $0x70] sm:$0xf] %v366_v59  ;;  %503 = vmatpush.msrb.mxu1 %v465_v62  ;;  %v189_v62 = vperm.slane %v989_v36, 2 }
 0x10c   :  { %v459_v33 = vld [vmem:[#allocation2 + $0x40] sm:$0xff] }
 0x10d   :  { %v256_v2 = vpop.permute.xlu2 %255  ;;  %v1170_v3 = vpop.permute.xlu1 %379 }
 0x10e   :  { %v261_v4 = vsel %vm257_vm6, %v256_v2, %v250_v55  ;;  %v385_v5 = vsel %vm381_vm7, %v1170_v3, %v1124_v29  ;;  %v252_v6 = vpop.permute.xlu0 %251 }
 0x10f   :  { %v271_v7 = vmul.f32 %v263_v63, %v261_v4  ;;  %v398_v8 = vmul.f32 %v390_v0, %v385_v5  ;;  %v260_v9 = vsel %vm257_vm6, %v250_v55, %v252_v6  ;;  %v190_v63 = vperm.slane %v989_v36, 3 }
 0x110   :  { %v272_v10 = vmul.f32 %v264_v1, %v260_v9  ;;  %v355_v1 = vperm.slane %v1146_v50, 0  ;;  %v356_v4 = vperm.slane %v1146_v50, 1  ;;  %v1226_v50 = vld [vmem:[%s1493_s1 + $0x2] ss:$8 sm:$0xf] }
 0x111   :  { %v279_v11 = vrot.slane %v271_v7, 4  ;;  %v406_v12 = vrot.slane %v398_v8, 4 }
 0x112   :  { %v280_v13 = vrot.slane %v272_v10, 4 }
 0x113   :  { %287 = vst [vmem:[#allocation2 + $0x88] sm:$0xf0] %v279_v11 }
 0x114   :  { %414 = vst [vmem:[#allocation2 + $0x70] sm:$0xf0] %v406_v12 }
 0x115   :  { %288 = vst [vmem:[#allocation2 + $0x68] sm:$0xf0] %v280_v13  ;;  %v180_v16 = vpop.permute.xlu2 %179  ;;  %v302_v17 = vpop.permute.xlu1 %301 }
 0x116   :  { %v306_v20 = vsel %vm305_vm4, %v302_v17, %v304_v37  ;;  %v307_v22 = vsel %vm305_vm4, %v1112_v19, %v302_v17  ;;  %v176_v23 = vpop.permute.xlu0 %175  ;;  %v187_v37 = vperm.slane %v989_v36, 0  ;;  %v389_v17 = vperm.slane %v1163_v61, 2  ;;  %v456_v36 = vld [vmem:[#allocation2 + $0x38] sm:$0xff] }
 0x117   :  { %v320_v24 = vmul.f32 %v312_v14, %v307_v22  ;;  %v321_v25 = vmul.f32 %v313_v15, %v306_v20  ;;  %v233_v15 = vperm.slane %v1226_v50, 2 }
 0x119   :  { %v328_v26 = vrot.slane %v320_v24, 4  ;;  %v329_v27 = vrot.slane %v321_v25, 4 }
 0x11b   :  { %336 = vst [vmem:[#allocation2 + $0x90] sm:$0xf0] %v328_v26  ;;  %v463_v28 = vld [vmem:[#allocation2 + $0x70] sm:$0xff] }
 0x11c   :  { %337 = vst [vmem:[#allocation2 + $0x78] sm:$0xf0] %v329_v27  ;;  %544 = vmatpush.msrb.mxu3 %v463_v28 }
 0x11d   :  { %v1188_v31 = vpop.permute.xlu2 %223  ;;  %v346_v32 = vpop.permute.xlu1 %345 }
 0x11e   :  { %v350_v34 = vsel %vm349_vm5, %v346_v32, %v348_v54  ;;  %545 = vmatpush.msrb.mxu3 %v459_v33  ;;  %v1192_v19 = vpop.permute.xlu0 %219  ;;  %v138_v33 = vld [vmem:[%s1493_s1] ss:$8 sm:$0xf] }
 0x11f   :  { %v365_v35 = vmul.f32 %v357_v30, %v350_v34 }
 0x121   :  { %369 = vst [vmem:[#allocation2 + $0x50] sm:$0xf] %v365_v35 }
 0x125   :  { %v174_v41 = vpop.permute.xlu2 %173  ;;  %v254_v42 = vpop.permute.xlu1 %253 }
 0x126   :  { %v184_v44 = vsel %vm181_vm8, %v174_v41, %v176_v23  ;;  %v185_v45 = vsel %vm181_vm8, %v180_v16, %v174_v41  ;;  %v258_v46 = vsel %vm257_vm6, %v254_v42, %v256_v2  ;;  %v259_v47 = vsel %vm257_vm6, %v252_v6, %v254_v42  ;;  %v376_v48 = vpop.permute.xlu0 %375 }
 0x127   :  { %v195_v49 = vmul.f32 %v187_v37, %v185_v45  ;;  %v196_v51 = vmul.f32 %v188_v38, %v184_v44  ;;  %v273_v52 = vmul.f32 %v265_v39, %v259_v47  ;;  %v274_v53 = vmul.f32 %v266_v40, %v258_v46 }
 0x128   :  { %v384_v54 = vsel %vm381_vm7, %v1124_v29, %v376_v48  ;;  %v158_v37 = vperm.slane %v138_v33, 3  ;;  %v155_v46 = vperm.slane %v138_v33, 0  ;;  %v156_v47 = vperm.slane %v138_v33, 1 }
 0x129   :  { %v203_v55 = vrot.slane %v195_v49, 4  ;;  %v204_v57 = vrot.slane %v196_v51, 4  ;;  %v281_v58 = vrot.slane %v273_v52, 4  ;;  %v282_v59 = vrot.slane %v274_v53, 4  ;;  %v457_v53 = vld [vmem:[#allocation2 + $0x90] sm:$0xff] }
 0x12a   :  { %v395_v60 = vmul.f32 %v387_v43, %v384_v54  ;;  %v231_v49 = vperm.slane %v1226_v50, 0  ;;  %v232_v51 = vperm.slane %v1226_v50, 1 }
 0x12b   :  { %211 = vst [vmem:[#allocation2 + $0x10] sm:$0xf0] %v203_v55 }
 0x12c   :  { %212 = vst [vmem:[#allocation2 + $0x48] sm:$0xf0] %v204_v57  ;;  %v403_v0 = vrot.slane %v395_v60, 4  ;;  %v458_v57 = vld [vmem:[#allocation2 + $0x78] sm:$0xff] }
 0x12d   :  { %289 = vst [vmem:[#allocation2 + $0x8] sm:$0xf0] %v281_v58  ;;  %v178_v2 = vpop.permute.xlu1 %177 }
 0x12e   :  { %290 = vst [vmem:[#allocation2 + $0x20] sm:$0xf0] %v282_v59  ;;  %v182_v29 = vsel %vm181_vm8, %v178_v2, %v180_v16  ;;  %v183_v5 = vsel %vm181_vm8, %v176_v23, %v178_v2  ;;  %v344_v6 = vpop.permute.xlu0 %343  ;;  %v234_v16 = vperm.slane %v1226_v50, 3 }
 0x12f   :  { %411 = vst [vmem:[#allocation2] sm:$0xf0] %v403_v0  ;;  %v197_v7 = vmul.f32 %v189_v62, %v183_v5  ;;  %v198_v8 = vmul.f32 %v190_v63, %v182_v29  ;;  %v351_v9 = vsel %vm349_vm5, %v344_v6, %v346_v32  ;;  %v352_v10 = vsel %vm349_vm5, %v1150_v56, %v344_v6  ;;  %v447_v29 = vld [vmem:[%s1494_s3] sm:$0xf] }
 0x130   :  { %v363_v11 = vmul.f32 %v355_v1, %v352_v10  ;;  %v364_v14 = vmul.f32 %v356_v4, %v351_v9  ;;  %v388_v56 = vperm.slane %v1163_v61, 1 }
 0x131   :  { %v205_v12 = vrot.slane %v197_v7, 4  ;;  %v206_v13 = vrot.slane %v198_v8, 4 }
 0x132   :  { %367 = vst [vmem:[#allocation2] sm:$0xf] %v363_v11 }
 0x133   :  { %213 = vst [vmem:[#allocation2 + $0x58] sm:$0xf0] %v205_v12 }
 0x134   :  { %214 = vst [vmem:[#allocation2 + $0x60] sm:$0xf0] %v206_v13 }
 0x135   :  { %368 = vst [vmem:[#allocation2 + $0x28] sm:$0xf] %v364_v14  ;;  %v222_v20 = vpop.permute.xlu1 %221 }
 0x136   :  { %v226_v22 = vsel %vm225_vm9, %v222_v20, %v1188_v31  ;;  %v227_v23 = vsel %vm225_vm9, %v1192_v19, %v222_v20  ;;  %v378_v24 = vpop.permute.xlu0 %377 }
 0x137   :  { %v241_v25 = vmul.f32 %v233_v15, %v227_v23  ;;  %v242_v26 = vmul.f32 %v234_v16, %v226_v22  ;;  %v382_v27 = vsel %vm381_vm7, %v378_v24, %v1170_v3  ;;  %v383_v61 = vsel %vm381_vm7, %v376_v48, %v378_v24  ;;  %v1006_v22 = vld [vmem:[%s1493_s1 + $0x20] ss:$8 sm:$0xf]  ;;  %v1321_v23 = vld [vmem:[%s1493_s1 + $0x3] ss:$8 sm:$0xf] }
 0x138   :  { %v396_v28 = vmul.f32 %v388_v56, %v383_v61  ;;  %v397_v30 = vmul.f32 %v389_v17, %v382_v27  ;;  %v157_v3 = vperm.slane %v138_v33, 2  ;;  %v1326_v24 = vld [vmem:[%s1493_s1 + $0x5] ss:$8 sm:$0xf] }
 0x139   :  { %245 = vst [vmem:[#allocation2 + $0x8] sm:$0xf] %v241_v25  ;;  %v460_v32 = vld [vmem:[#allocation2] sm:$0xff]  ;;  %v832_v25 = vperm.slane %v1006_v22, 0  ;;  %v718_v27 = vperm.slane %v1326_v24, 0 }
 0x13a   :  { %246 = vst [vmem:[#allocation2 + $0x20] sm:$0xf] %v242_v26  ;;  %v404_v34 = vrot.slane %v396_v28, 4  ;;  %v405_v35 = vrot.slane %v397_v30, 4  ;;  %484 = vmatpush.msrb.mxu0 %v460_v32  ;;  %v673_v26 = vperm.slane %v1321_v23, 1 }
 0x13c   :  { %412 = vst [vmem:[#allocation2 + $0x28] sm:$0xf0] %v404_v34  ;;  %485 = vmatpush.msrb.mxu0 %v456_v36 }
 0x13d   :  { %413 = vst [vmem:[#allocation2 + $0x50] sm:$0xf0] %v405_v35  ;;  %v146_v38 = vpop.permute.xlu1 %145 }
 0x13e   :  { %v144_v39 = vpop.permute.xlu0 %143 }
 0x13f   :  { %v150_v40 = vsel %vm149_vm10, %v144_v39, %v146_v38  ;;  %v151_v41 = vsel %vm149_vm10, %v1110_v18, %v144_v39 }
 0x140   :  { %v165_v42 = vmul.f32 %v157_v3, %v151_v41  ;;  %v166_v43 = vmul.f32 %v158_v37, %v150_v40 }
 0x141   :  { %v455_v44 = vld [vmem:[#allocation2 + $0x20] sm:$0xff] }
 0x142   :  { %169 = vst [vmem:[#allocation2 + $0x58] sm:$0xf] %v165_v42  ;;  %546 = vmatpush.msrb.mxu3 %v455_v44 }
 0x143   :  { %170 = vst [vmem:[#allocation2 + $0x60] sm:$0xf] %v166_v43  ;;  %v461_v45 = vld [vmem:[#allocation2 + $0x28] sm:$0xff] }
 0x144   :  { %504 = vmatpush.msrb.mxu1 %v461_v45  ;;  %v462_v48 = vld [vmem:[#allocation2 + $0x50] sm:$0xff] }
 0x145   :  { %524 = vmatpush.msrb.mxu2 %v462_v48  ;;  %v140_v52 = vpop.permute.xlu1 %139 }
 0x146   :  { %v152_v54 = vsel %vm149_vm10, %v140_v52, %v1110_v18  ;;  %v153_v55 = vsel %vm149_vm10, %v146_v38, %v140_v52  ;;  %505 = vmatpush.msrb.mxu1 %v457_v53  ;;  %v218_v58 = vpop.permute.xlu0 %217  ;;  %v454_v18 = vld [vmem:[#allocation2 + $0x8] sm:$0xff]  ;;  %v833_v53 = vperm.slane %v1006_v22, 1 }
 0x147   :  { %v163_v59 = vmul.f32 %v155_v46, %v153_v55  ;;  %v164_v60 = vmul.f32 %v156_v47, %v152_v54  ;;  %525 = vmatpush.msrb.mxu2 %v458_v57  ;;  %v228_v62 = vsel %vm225_vm9, %v218_v58, %v1192_v19  ;;  %v229_v63 = vsel %vm225_vm9, %v1188_v31, %v218_v58  ;;  %v1005_v38 = vld [vmem:[%s1493_s1 + $0x7] ss:$8 sm:$0xf] }
 0x148   :  { %v239_v0 = vmul.f32 %v231_v49, %v229_v63  ;;  %v240_v1 = vmul.f32 %v232_v51, %v228_v62  ;;  %v793_v40 = vperm.slane %v1005_v38, 3  ;;  %v792_v41 = vperm.slane %v1005_v38, 2 }
 0x149   :  { %167 = vst [vmem:[#allocation2 + $0x10] sm:$0xf] %v163_v59  ;;  %526 = vmatpush.msrb.mxu2 %v454_v18  ;;  %v450_v2 = vld [vmem:[#allocation2 + $0x58] sm:$0xff]  ;;  %v835_v54 = vperm.slane %v1006_v22, 3  ;;  %v834_v55 = vperm.slane %v1006_v22, 2 }
 0x14a   :  { %168 = vst [vmem:[#allocation2 + $0x48] sm:$0xf] %v164_v60  ;;  %v451_v4 = vld [vmem:[#allocation2 + $0x60] sm:$0xff] }
 0x14b   :  { %243 = vst [vmem:[#allocation2 + $0x88] sm:$0xf] %v239_v0  ;;  %527 = vmatpush.msrb.mxu2 %v450_v2  ;;  %547 = vmatpush.msrb.mxu3 %v451_v4  ;;  %v719_v2 = vperm.slane %v1326_v24, 1  ;;  %v790_v4 = vperm.slane %v1005_v38, 0 }
 0x14c   :  { %244 = vst [vmem:[#allocation2 + $0x68] sm:$0xf] %v240_v1  ;;  %998 = vmatmul.msk.f32.vlgmr.msrb.gmra.mxu2 %vm468_vm11, %v447_v29  ;;  %999 = vmatmul.msk.f32.vlgmr.msrb.gmra.mxu3 %vm468_vm11, %v447_v29 }
 0x150   :  { %v448_v5 = vld [vmem:[#allocation2 + $0x10] sm:$0xff] }
 0x151   :  { %v449_v6 = vld [vmem:[#allocation2 + $0x48] sm:$0xff] }
 0x152   :  { %v452_v31 = vld [vmem:[#allocation2 + $0x88] sm:$0xff] }
 0x153   :  { %486 = vmatpush.msrb.mxu0 %v452_v31  ;;  %v453_v19 = vld [vmem:[#allocation2 + $0x68] sm:$0xff]  ;;  %v720_v31 = vperm.slane %v1326_v24, 2 }
 0x154   :  { %506 = vmatpush.msrb.mxu1 %v453_v19  ;;  %v791_v19 = vperm.slane %v1005_v38, 1 }
 0x155   :  { %487 = vmatpush.msrb.mxu0 %v448_v5 }
 0x156   :  { %507 = vmatpush.msrb.mxu1 %v449_v6  ;;  %996 = vmatmul.msk.f32.vlgmr.msrb.gmra.mxu0 %vm468_vm11, %v447_v29 }
 0x157   :  { %997 = vmatmul.msk.f32.vlgmr.msrb.gmra.mxu1 %vm468_vm11, %v447_v29  ;;  %v721_v29 = vperm.slane %v1326_v24, 3 }
 0x1cf   :  { %v529_v7 = vpop.f32.mrf.mxu2  ;;  %v549_v8 = vpop.f32.mrf.mxu3 }
 0x1d0   :  { %v554_v9 = vmax.f32 %v529_v7, 0.0  ;;  %v555_v10 = vmax.f32 %v549_v8, 0.0 }
 0x1d2   :  { %702 = vst [vmem:[#allocation2 + $0x78] sm:$0xf] %v554_v9 }
 0x1d3   :  { %v489_v11 = vpop.f32.mrf.mxu0  ;;  %703 = vst [vmem:[#allocation2 + $0x40] sm:$0xf] %v555_v10 }
 0x1d4   :  { %v552_v50 = vmax.f32 %v489_v11, 0.0  ;;  %v509_v12 = vpop.f32.mrf.mxu1 }
 0x1d5   :  { %v553_v13 = vmax.f32 %v509_v12, 0.0 }
 0x1d6   :  { %700 = vst [vmem:[#allocation2 + $0x38] sm:$0xf] %v552_v50  ;;  %659 = vrot.lane.b32.xlu0 %v552_v50, %s1028_s30  ;;  %777 = vrot.lane.b32.xlu2 %v552_v50, %s1026_s29 }
 0x1d7   :  { %701 = vst [vmem:[#allocation2 + $0x90] sm:$0xf] %v553_v13  ;;  %559 = vrot.lane.b32.xlu1 %v553_v13, %s1024_s2 }
 0x1de   :  { %821 = vrot.lane.b32.xlu0 %v553_v13, %s1025_s28  ;;  %819 = vrot.lane.b32.xlu2 %v552_v50, %s1025_s28 }
 0x1df   :  { %707 = vrot.lane.b32.xlu1 %v553_v13, %s1027_s0 }
 0x1e6   :  { %781 = vrot.lane.b32.xlu0 %v554_v9, %s1026_s29  ;;  %705 = vrot.lane.b32.xlu2 %v552_v50, %s1027_s0 }
 0x1e7   :  { %783 = vrot.lane.b32.xlu1 %v555_v10, %s1026_s29 }
 0x1ee   :  { %823 = vrot.lane.b32.xlu0 %v554_v9, %s1025_s28  ;;  %747 = vrot.lane.b32.xlu2 %v552_v50, %s1029_s6 }
 0x1ef   :  { %825 = vrot.lane.b32.xlu1 %v555_v10, %s1025_s28 }
 0x1f6   :  { %709 = vrot.lane.b32.xlu0 %v554_v9, %s1027_s0  ;;  %661 = vrot.lane.b32.xlu2 %v553_v13, %s1028_s30 }
 0x1f7   :  { %711 = vrot.lane.b32.xlu1 %v555_v10, %s1027_s0 }
 0x1fe   :  { %751 = vrot.lane.b32.xlu0 %v554_v9, %s1029_s6  ;;  %589 = vrot.lane.b32.xlu2 %v553_v13, %s1030_s7 }
 0x1ff   :  { %753 = vrot.lane.b32.xlu1 %v555_v10, %s1029_s6 }
 0x206   :  { %663 = vrot.lane.b32.xlu0 %v554_v9, %s1028_s30  ;;  %631 = vrot.lane.b32.xlu2 %v553_v13, %s1031_s8 }
 0x207   :  { %665 = vrot.lane.b32.xlu1 %v555_v10, %s1028_s30 }
 0x20e   :  { %591 = vrot.lane.b32.xlu0 %v554_v9, %s1030_s7  ;;  %779 = vrot.lane.b32.xlu2 %v553_v13, %s1026_s29 }
 0x20f   :  { %593 = vrot.lane.b32.xlu1 %v555_v10, %s1030_s7 }
 0x216   :  { %633 = vrot.lane.b32.xlu0 %v554_v9, %s1031_s8  ;;  %749 = vrot.lane.b32.xlu2 %v553_v13, %s1029_s6 }
 0x217   :  { %635 = vrot.lane.b32.xlu1 %v555_v10, %s1031_s8 }
 0x21e   :  { %563 = vrot.lane.b32.xlu0 %v555_v10, %s1024_s2  ;;  %561 = vrot.lane.b32.xlu2 %v554_v9, %s1024_s2 }
 0x21f   :  { %587 = vrot.lane.b32.xlu1 %v552_v50, %s1030_s7 }
 0x226   :  { %557 = vrot.lane.b32.xlu0 %v552_v50, %s1024_s2  ;;  %629 = vrot.lane.b32.xlu2 %v552_v50, %s1031_s8 }
 0x230   :  { %v1305_v14 = vpop.permute.xlu2 %777 }
 0x238   :  { %v820_v15 = vpop.permute.xlu2 %819 }
 0x240   :  { %v1307_v16 = vpop.permute.xlu2 %705 }
 0x248   :  { %v1309_v56 = vpop.permute.xlu0 %659  ;;  %v1311_v17 = vpop.permute.xlu2 %747 }
 0x249   :  { %v1313_v20 = vpop.permute.xlu1 %559 }
 0x250   :  { %v822_v61 = vpop.permute.xlu0 %821  ;;  %v1330_v28 = vpop.permute.xlu2 %661 }
 0x251   :  { %v708_v30 = vpop.permute.xlu1 %707  ;;  %v829_v32 = vsel %vm425_vm3, %v820_v15, %v822_v61  ;;  %v669_v33 = vsel %vm257_vm6, %v1309_v56, %v1330_v28 }
 0x252   :  { %v715_v34 = vsel %vm305_vm4, %v1307_v16, %v708_v30  ;;  %v840_v35 = vmul.f32 %v832_v25, %v829_v32  ;;  %v681_v36 = vmul.f32 %v673_v26, %v669_v33  ;;  %v1004_v26 = vld [vmem:[%s1493_s1 + $0x6] ss:$8 sm:$0xf] }
 0x253   :  { %v726_v3 = vmul.f32 %v718_v27, %v715_v34  ;;  %v760_v34 = vperm.slane %v1004_v26, 0 }
 0x254   :  { %844 = vst [vmem:[#allocation2 + $0x80] sm:$0xf] %v840_v35  ;;  %v689_v37 = vrot.slane %v681_v36, 4  ;;  %v763_v35 = vperm.slane %v1004_v26, 3  ;;  %v762_v36 = vperm.slane %v1004_v26, 2 }
 0x255   :  { %v734_v39 = vrot.slane %v726_v3, 4  ;;  %v761_v3 = vperm.slane %v1004_v26, 1 }
 0x256   :  { %697 = vst [vmem:[#allocation2 + $0x68] sm:$0xf0] %v689_v37 }
 0x257   :  { %742 = vst [vmem:[#allocation2 + $0x38] sm:$0xf0] %v734_v39 }
 0x258   :  { %v782_v42 = vpop.permute.xlu0 %781  ;;  %v1344_v43 = vpop.permute.xlu2 %589 }
 0x259   :  { %v784_v44 = vpop.permute.xlu1 %783 }
 0x25a   :  { %v788_v45 = vsel %vm381_vm7, %v784_v44, %v1305_v14  ;;  %v785_v46 = vsel %vm381_vm7, %v782_v42, %v784_v44 }
 0x25b   :  { %v801_v47 = vmul.f32 %v793_v40, %v788_v45  ;;  %v800_v48 = vmul.f32 %v792_v41, %v785_v46  ;;  %v866_v49 = vld [vmem:[#allocation2 + $0x80] sm:$0xff] }
 0x25c   :  { %887 = vmatpush.msra.mxu0 %v866_v49  ;;  %v1390_v49 = vld [vmem:[%s1493_s1] ss:$8 sm:$0xf] }
 0x25d   :  { %v809_v51 = vrot.slane %v801_v47, 4  ;;  %v808_v52 = vrot.slane %v800_v48, 4 }
 0x25f   :  { %817 = vst [vmem:[#allocation2 + $0x70] sm:$0xf0] %v809_v51  ;;  %v674_v51 = vperm.slane %v1321_v23, 2 }
 0x260   :  { %816 = vst [vmem:[#allocation2 + $0x50] sm:$0xf0] %v808_v52  ;;  %v824_v57 = vpop.permute.xlu0 %823  ;;  %v1351_v58 = vpop.permute.xlu2 %631  ;;  %v572_v52 = vperm.slane %v1390_v49, 2 }
 0x261   :  { %v826_v59 = vpop.permute.xlu1 %825  ;;  %v828_v60 = vsel %vm425_vm3, %v822_v61, %v824_v57 }
 0x262   :  { %v830_v62 = vsel %vm425_vm3, %v826_v59, %v820_v15  ;;  %v827_v63 = vsel %vm425_vm3, %v824_v57, %v826_v59  ;;  %v841_v0 = vmul.f32 %v833_v53, %v828_v60  ;;  %v675_v53 = vperm.slane %v1321_v23, 3 }
 0x263   :  { %v843_v1 = vmul.f32 %v835_v54, %v830_v62  ;;  %v842_v18 = vmul.f32 %v834_v55, %v827_v63 }
 0x264   :  { %845 = vst [vmem:[#allocation2 + $0x18] sm:$0xf] %v841_v0 }
 0x265   :  { %847 = vst [vmem:[#allocation2 + $0x98] sm:$0xf] %v843_v1  ;;  %v1413_v1 = vld [vmem:[%s1493_s1 + $0x1] ss:$8 sm:$0xf] }
 0x266   :  { %846 = vst [vmem:[#allocation2 + $0x30] sm:$0xf] %v842_v18 }
 0x268   :  { %v710_v5 = vpop.permute.xlu0 %709  ;;  %v780_v6 = vpop.permute.xlu2 %779 }
 0x269   :  { %v712_v7 = vpop.permute.xlu1 %711  ;;  %v714_v8 = vsel %vm305_vm4, %v708_v30, %v710_v5  ;;  %v786_v9 = vsel %vm381_vm7, %v780_v6, %v782_v42  ;;  %v787_v10 = vsel %vm381_vm7, %v1305_v14, %v780_v6  ;;  %v858_v6 = vld [vmem:[#allocation2 + $0x38] sm:$0xff] }
 0x26a   :  { %v716_v11 = vsel %vm305_vm4, %v712_v7, %v1307_v16  ;;  %v713_v50 = vsel %vm305_vm4, %v710_v5, %v712_v7  ;;  %v727_v12 = vmul.f32 %v719_v2, %v714_v8  ;;  %v798_v13 = vmul.f32 %v790_v4, %v787_v10  ;;  %v1001_v4 = vld [vmem:[%s1493_s1 + $0x2] ss:$8 sm:$0xf] }
 0x26b   :  { %v729_v15 = vmul.f32 %v721_v29, %v716_v11  ;;  %v728_v22 = vmul.f32 %v720_v31, %v713_v50  ;;  %v799_v24 = vmul.f32 %v791_v19, %v786_v9  ;;  %v867_v25 = vld [vmem:[#allocation2 + $0x18] sm:$0xff]  ;;  %v602_v9 = vperm.slane %v1413_v1, 2 }
 0x26c   :  { %v735_v27 = vrot.slane %v727_v12, 4  ;;  %910 = vmatpush.msra.mxu1 %v867_v25  ;;  %v869_v14 = vld [vmem:[#allocation2 + $0x98] sm:$0xff]  ;;  %v806_v32 = vrot.slane %v798_v13, 4  ;;  %v643_v10 = vperm.slane %v1001_v4, 1  ;;  %v603_v50 = vperm.slane %v1413_v1, 3 }
 0x26d   :  { %v737_v61 = vrot.slane %v729_v15, 4  ;;  %v736_v30 = vrot.slane %v728_v22, 4  ;;  %v868_v16 = vld [vmem:[#allocation2 + $0x30] sm:$0xff]  ;;  %956 = vmatpush.msra.mxu3 %v869_v14  ;;  %v807_v33 = vrot.slane %v799_v24, 4 }
 0x26e   :  { %743 = vst [vmem:[#allocation2 + $0x90] sm:$0xf0] %v735_v27  ;;  %933 = vmatpush.msra.mxu2 %v868_v16  ;;  %v644_v16 = vperm.slane %v1001_v4, 2 }
 0x26f   :  { %745 = vst [vmem:[#allocation2 + $0x40] sm:$0xf0] %v737_v61 }
 0x270   :  { %744 = vst [vmem:[#allocation2 + $0x78] sm:$0xf0] %v736_v30  ;;  %v752_v37 = vpop.permute.xlu0 %751  ;;  %v750_v38 = vpop.permute.xlu2 %749 }
 0x271   :  { %814 = vst [vmem:[#allocation2] sm:$0xf0] %v806_v32  ;;  %v754_v39 = vpop.permute.xlu1 %753  ;;  %v756_v40 = vsel %vm349_vm5, %v750_v38, %v752_v37  ;;  %v757_v41 = vsel %vm349_vm5, %v1311_v17, %v750_v38 }
 0x272   :  { %815 = vst [vmem:[#allocation2 + $0x28] sm:$0xf0] %v807_v33  ;;  %v758_v42 = vsel %vm349_vm5, %v754_v39, %v1311_v17  ;;  %v755_v44 = vsel %vm349_vm5, %v752_v37, %v754_v39  ;;  %v768_v45 = vmul.f32 %v760_v34, %v757_v41  ;;  %v769_v48 = vmul.f32 %v761_v3, %v756_v40 }
 0x273   :  { %v771_v46 = vmul.f32 %v763_v35, %v758_v42  ;;  %v770_v47 = vmul.f32 %v762_v36, %v755_v44  ;;  %v672_v17 = vperm.slane %v1321_v23, 0  ;;  %v642_v33 = vperm.slane %v1001_v4, 0 }
 0x274   :  { %772 = vst [vmem:[#allocation2] sm:$0xf] %v768_v45  ;;  %v645_v34 = vperm.slane %v1001_v4, 3  ;;  %v573_v44 = vperm.slane %v1390_v49, 3  ;;  %v600_v45 = vperm.slane %v1413_v1, 0 }
 0x275   :  { %775 = vst [vmem:[#allocation2 + $0x70] sm:$0xf] %v771_v46  ;;  %v859_v12 = vld [vmem:[#allocation2 + $0x90] sm:$0xff] }
 0x276   :  { %774 = vst [vmem:[#allocation2 + $0x50] sm:$0xf] %v770_v47  ;;  %v861_v8 = vld [vmem:[#allocation2 + $0x40] sm:$0xff] }
 0x277   :  { %773 = vst [vmem:[#allocation2 + $0x28] sm:$0xf] %v769_v48  ;;  %v860_v11 = vld [vmem:[#allocation2 + $0x78] sm:$0xff] }
 0x278   :  { %v664_v54 = vpop.permute.xlu0 %663  ;;  %v1396_v55 = vpop.permute.xlu2 %561 }
 0x279   :  { %v666_v57 = vpop.permute.xlu1 %665  ;;  %v668_v59 = vsel %vm257_vm6, %v1330_v28, %v664_v54  ;;  %v566_v60 = vsel %vm149_vm10, %v1313_v20, %v1396_v55 }
 0x27a   :  { %v670_v62 = vsel %vm257_vm6, %v666_v57, %v1309_v56  ;;  %v667_v23 = vsel %vm257_vm6, %v664_v54, %v666_v57  ;;  %v682_v63 = vmul.f32 %v674_v51, %v668_v59  ;;  %v580_v0 = vmul.f32 %v572_v52, %v566_v60  ;;  %v848_v60 = vld [vmem:[%s1495_s4] sm:$0xff] }
 0x27b   :  { %v680_v28 = vmul.f32 %v672_v17, %v670_v62  ;;  %v683_v18 = vmul.f32 %v675_v53, %v667_v23  ;;  %v862_v2 = vld [vmem:[#allocation2] sm:$0xff] }
 0x27c   :  { %v690_v29 = vrot.slane %v682_v63, 4  ;;  %584 = vst [vmem:[#allocation2 + $0x58] sm:$0xf] %v580_v0  ;;  %888 = vmatpush.msra.mxu0 %v862_v2  ;;  %v865_v56 = vld [vmem:[#allocation2 + $0x70] sm:$0xff]  ;;  %v571_v0 = vperm.slane %v1390_v49, 1 }
 0x27d   :  { %v688_v31 = vrot.slane %v680_v28, 4  ;;  %v691_v19 = vrot.slane %v683_v18, 4  ;;  %v864_v5 = vld [vmem:[#allocation2 + $0x50] sm:$0xff]  ;;  %957 = vmatpush.msra.mxu3 %v865_v56 }
 0x27e   :  { %698 = vst [vmem:[#allocation2 + $0x8] sm:$0xf0] %v690_v29  ;;  %v863_v7 = vld [vmem:[#allocation2 + $0x28] sm:$0xff]  ;;  %934 = vmatpush.msra.mxu2 %v864_v5  ;;  %889 = vmatpush.msra.mxu0 %v858_v6 }
 0x27f   :  { %696 = vst [vmem:[#allocation2 + $0x88] sm:$0xf0] %v688_v31  ;;  %911 = vmatpush.msra.mxu1 %v863_v7  ;;  %958 = vmatpush.msra.mxu3 %v861_v8 }
 0x280   :  { %699 = vst [vmem:[#allocation2 + $0x20] sm:$0xf0] %v691_v19  ;;  %935 = vmatpush.msra.mxu2 %v860_v11  ;;  %v592_v13 = vpop.permute.xlu0 %591  ;;  %v630_v15 = vpop.permute.xlu2 %629 }
 0x281   :  { %912 = vmatpush.msra.mxu1 %v859_v12  ;;  %v594_v22 = vpop.permute.xlu1 %593  ;;  %v596_v24 = vsel %vm181_vm8, %v1344_v43, %v592_v13  ;;  %v639_v25 = vsel %vm225_vm9, %v630_v15, %v1351_v58 }
 0x282   :  { %v595_v26 = vsel %vm181_vm8, %v592_v13, %v594_v22  ;;  %v610_v27 = vmul.f32 %v602_v9, %v596_v24  ;;  %v651_v14 = vmul.f32 %v643_v10, %v639_v25 }
 0x283   :  { %v611_v61 = vmul.f32 %v603_v50, %v595_v26 }
 0x284   :  { %v618_v30 = vrot.slane %v610_v27, 4  ;;  %655 = vst [vmem:[#allocation2 + $0x68] sm:$0xf] %v651_v14 }
 0x285   :  { %v619_v32 = vrot.slane %v611_v61, 4 }
 0x286   :  { %626 = vst [vmem:[#allocation2 + $0x58] sm:$0xf0] %v618_v30 }
 0x287   :  { %627 = vst [vmem:[#allocation2 + $0x60] sm:$0xf0] %v619_v32 }
 0x288   :  { %v634_v35 = vpop.permute.xlu0 %633 }
 0x289   :  { %v636_v36 = vpop.permute.xlu1 %635  ;;  %v638_v3 = vsel %vm225_vm9, %v1351_v58, %v634_v35  ;;  %v601_v58 = vperm.slane %v1413_v1, 1 }
 0x28a   :  { %v640_v37 = vsel %vm225_vm9, %v636_v36, %v630_v15  ;;  %v637_v38 = vsel %vm225_vm9, %v634_v35, %v636_v36  ;;  %v652_v39 = vmul.f32 %v644_v16, %v638_v3 }
 0x28b   :  { %v650_v40 = vmul.f32 %v642_v33, %v640_v37  ;;  %v653_v41 = vmul.f32 %v645_v34, %v637_v38  ;;  %v855_v42 = vld [vmem:[#allocation2 + $0x68] sm:$0xff] }
 0x28c   :  { %656 = vst [vmem:[#allocation2 + $0x8] sm:$0xf] %v652_v39  ;;  %913 = vmatpush.msra.mxu1 %v855_v42 }
 0x28d   :  { %654 = vst [vmem:[#allocation2 + $0x88] sm:$0xf] %v650_v40  ;;  %v852_v63 = vld [vmem:[#allocation2 + $0x58] sm:$0xff] }
 0x28e   :  { %657 = vst [vmem:[#allocation2 + $0x20] sm:$0xf] %v653_v41 }
 0x290   :  { %v564_v46 = vpop.permute.xlu0 %563 }
 0x291   :  { %v588_v47 = vpop.permute.xlu1 %587  ;;  %v565_v48 = vsel %vm149_vm10, %v1396_v55, %v564_v46 }
 0x292   :  { %v597_v51 = vsel %vm181_vm8, %v588_v47, %v1344_v43  ;;  %v598_v52 = vsel %vm181_vm8, %v594_v22, %v588_v47  ;;  %v581_v17 = vmul.f32 %v573_v44, %v565_v48  ;;  %v570_v43 = vperm.slane %v1390_v49, 0  ;;  %v849_v49 = vld [vmem:[%s1495_s4 + $0x8] sm:$0xff] }
 0x293   :  { %v608_v53 = vmul.f32 %v600_v45, %v598_v52  ;;  %v609_v54 = vmul.f32 %v601_v58, %v597_v51  ;;  %v856_v57 = vld [vmem:[#allocation2 + $0x8] sm:$0xff] }
 0x294   :  { %585 = vst [vmem:[#allocation2 + $0x60] sm:$0xf] %v581_v17  ;;  %v854_v59 = vld [vmem:[#allocation2 + $0x88] sm:$0xff]  ;;  %936 = vmatpush.msra.mxu2 %v856_v57 }
 0x295   :  { %v616_v62 = vrot.slane %v608_v53, 4  ;;  %v617_v55 = vrot.slane %v609_v54, 4  ;;  %890 = vmatpush.msra.mxu0 %v854_v59  ;;  %v857_v23 = vld [vmem:[#allocation2 + $0x20] sm:$0xff] }
 0x296   :  { %959 = vmatpush.msra.mxu3 %v857_v23  ;;  %937 = vmatpush.msra.mxu2 %v852_v63 }
 0x297   :  { %624 = vst [vmem:[#allocation2 + $0x10] sm:$0xf0] %v616_v62  ;;  %1011 = vmatmul.msk.f32.vlgmr.msra.gmra.mxu2 %vm468_vm11, %v848_v60 }
 0x298   :  { %625 = vst [vmem:[#allocation2 + $0x48] sm:$0xf0] %v617_v55  ;;  %v558_v1 = vpop.permute.xlu0 %557 }
 0x299   :  { %v567_v28 = vsel %vm149_vm10, %v558_v1, %v1313_v20  ;;  %v568_v18 = vsel %vm149_vm10, %v564_v46, %v558_v1 }
 0x29a   :  { %v578_v2 = vmul.f32 %v570_v43, %v568_v18  ;;  %v579_v4 = vmul.f32 %v571_v0, %v567_v28 }
 0x29b   :  { %v853_v29 = vld [vmem:[#allocation2 + $0x60] sm:$0xff] }
 0x29c   :  { %582 = vst [vmem:[#allocation2 + $0x10] sm:$0xf] %v578_v2  ;;  %960 = vmatpush.msra.mxu3 %v853_v29 }
 0x29d   :  { %583 = vst [vmem:[#allocation2 + $0x48] sm:$0xf] %v579_v4  ;;  %1013 = vmatmul.msk.f32.vlgmr.msra.gmra.mxu3 %vm468_vm11, %v848_v60 }
 0x29f   :  { %1012 = vmatmul.msk.f32.gmra.mxu2 %vm468_vm11, %v849_v49 }
 0x2a3   :  { %v850_v56 = vld [vmem:[#allocation2 + $0x10] sm:$0xff] }
 0x2a4   :  { %891 = vmatpush.msra.mxu0 %v850_v56  ;;  %v851_v20 = vld [vmem:[#allocation2 + $0x48] sm:$0xff] }
 0x2a5   :  { %914 = vmatpush.msra.mxu1 %v851_v20  ;;  %1007 = vmatmul.msk.f32.vlgmr.msra.gmra.mxu0 %vm468_vm11, %v848_v60 }
 0x2a6   :  { %1009 = vmatmul.msk.f32.vlgmr.msra.gmra.mxu1 %vm468_vm11, %v848_v60  ;;  %1014 = vmatmul.msk.f32.gmra.mxu3 %vm468_vm11, %v849_v49 }
 0x2ad   :  { %1008 = vmatmul.msk.f32.gmra.mxu0 %vm468_vm11, %v849_v49 }
 0x2ae   :  { %1010 = vmatmul.msk.f32.gmra.mxu1 %vm468_vm11, %v849_v49 }
 0x31a   :  { %v939_v21 = vpop.f32.mrf.mxu2 }
 0x31b   :  { %970 = vst [vmem:[%s1496_s5 + $0x10] sm:$0xff] %v939_v21 }
 0x320   :  { %v962_v31 = vpop.f32.mrf.mxu3 }
 0x321   :  { %971 = vst [vmem:[%s1496_s5 + $0x18] sm:$0xff] %v962_v31 }
 0x322   :  { %v893_v19 = vpop.f32.mrf.mxu0  ;;  %v942_v5 = vpop.f32.mrf.mxu2 }
 0x323   :  { %968 = vst [vmem:[%s1496_s5] sm:$0xff] %v893_v19  ;;  %v916_v6 = vpop.f32.mrf.mxu1 }
 0x324   :  { %969 = vst [vmem:[%s1496_s5 + $0x8] sm:$0xff] %v916_v6 }
 0x325   :  { %974 = vst [vmem:[%s1496_s5 + $0x30] sm:$0xff] %v942_v5 }
 0x329   :  { %v965_v7 = vpop.f32.mrf.mxu3 }
 0x32a   :  { %v896_v8 = vpop.f32.mrf.mxu0  ;;  %975 = vst [vmem:[%s1496_s5 + $0x38] sm:$0xff] %v965_v7 }
 0x32b   :  { %972 = vst [vmem:[%s1496_s5 + $0x20] sm:$0xff] %v896_v8  ;;  %v919_v9 = vpop.f32.mrf.mxu1 }
 0x32c   :  { %973 = vst [vmem:[%s1496_s5 + $0x28] sm:$0xff] %v919_v9 }

</bundles_post_ra>
